<compile_context>
chip_gen: v6e
topology: v6e:2x2x1
jax: 0.10.0
libtpu: 0.0.40
codegen_flags: <defaults>
</compile_context>

<pallas_src>
import jax
import jax.numpy as jnp
from jax.experimental import pallas as pl
from jax.experimental.pallas import tpu as pltpu

BN_EPS = 1e-5
LANE = 128      # vreg lane width
SUBLANE = 8     # f32 sublane count
SUBPACK = 16    # bf16 sublane packing (pad contraction / hidden dims to this)


def _round_up(n, m):
    return ((n + m - 1) // m) * m


def _pad2d(x, rows, cols):
    r, c = x.shape
    return jnp.pad(x, ((0, rows - r), (0, cols - c)))


# ---------------------------------------------------------------------------
# Fused Pallas kernel: x -> [matmul + bias + ReLU]*(L-1) -> matmul + bias
# ---------------------------------------------------------------------------
def _make_fused_mlp_kernel(n_dims):
    """n_dims: static tuple of padded output widths, one per linear layer."""
    n_layers = len(n_dims)

    def kernel(*refs):
        # refs = (x, w_0, ..., w_{L-1}, bias_stack, out)
        x_ref = refs[0]
        w_refs = refs[1:1 + n_layers]
        b_ref = refs[1 + n_layers]
        o_ref = refs[2 + n_layers]

        b_all = b_ref[...]                       # [n_layers, max_n_p] f32
        h = x_ref[...]                           # bf16 activations
        for i in range(n_layers - 1):            # hidden: matmul+bias+ReLU
            n_p = n_dims[i]
            z = jnp.dot(h, w_refs[i][...],
                        preferred_element_type=jnp.float32)
            z = z + b_all[i:i + 1, :n_p]
            h = jnp.maximum(z, 0.0).astype(jnp.bfloat16)
        n_p = n_dims[-1]                         # classifier: matmul+bias
        z = jnp.dot(h, w_refs[-1][...],
                    preferred_element_type=jnp.float32)
        o_ref[...] = (z + b_all[n_layers - 1:n_layers, :n_p]).astype(o_ref.dtype)

    return kernel


# ---------------------------------------------------------------------------
# One-time parameter preparation: BN fold (f32) -> pad -> cast bf16 -> pack
# ---------------------------------------------------------------------------
def prepare_fc_classifier(params, in_dim):
    w_clf, b_clf = params["clf"]["w_t"], params["clf"]["b"]
    num_classes = w_clf.shape[1]

    in_dim_p = _round_up(in_dim, SUBPACK)
    weights, biases, n_dims = [], [], []
    cur_k_p = in_dim_p

    for layer in params["hidden"]:
        # Fold BatchNorm1d (eval) into the Linear, all in f32.
        scale = layer["gamma"] * jax.lax.rsqrt(layer["var"] + BN_EPS)   # [1,H]
        w_eff = layer["w_t"] * scale                                    # [K,H]
        b_eff = (layer["b"] - layer["mean"]) * scale + layer["beta"]    # [1,H]
        n_p = _round_up(w_eff.shape[1], SUBPACK)   # hidden dims: NOT padded to 128
        weights.append(_pad2d(w_eff, cur_k_p, n_p).astype(jnp.bfloat16))
        biases.append(jnp.pad(b_eff[0], (0, n_p - b_eff.shape[1])))
        n_dims.append(n_p)
        cur_k_p = n_p

    # Classifier layer: pad output lane dim to 128 for a dense final store.
    c_p = _round_up(num_classes, LANE)
    weights.append(_pad2d(w_clf, cur_k_p, c_p).astype(jnp.bfloat16))
    biases.append(jnp.pad(b_clf[0], (0, c_p - num_classes)))
    n_dims.append(c_p)

    max_n = max(n_dims)
    bias_stack = jnp.stack(
        [jnp.pad(b, (0, max_n - b.shape[0])) for b in biases]
    ).astype(jnp.float32)                          # single packed bias input

    return {
        "weights": weights,            # bf16, BN-folded, padded (done once)
        "bias_stack": bias_stack,      # f32 [n_layers, max_n]
        "n_dims": tuple(n_dims),
        "in_dim": in_dim,
        "in_dim_p": in_dim_p,
        "num_classes": num_classes,
    }


# ---------------------------------------------------------------------------
# Forward: pad the activation only, single fused pallas_call
# ---------------------------------------------------------------------------
def fc_classifier_forward(prepared, emb):
    B, d_in = emb.shape
    assert d_in == prepared["in_dim"]
    weights = prepared["weights"]
    bias_stack = prepared["bias_stack"]
    n_dims = prepared["n_dims"]
    in_dim_p = prepared["in_dim_p"]
    num_classes = prepared["num_classes"]
    cout_p = n_dims[-1]

    Bp = _round_up(max(B, SUBLANE), SUBLANE)
    emb_p = _pad2d(emb, Bp, in_dim_p).astype(jnp.bfloat16)

    args = [emb_p] + list(weights) + [bias_stack]

    # Advisory cost estimate + explicit scoped-VMEM limit.
    flops, k = 0, in_dim_p
    for n in n_dims:
        flops += 2 * Bp * k * n
        k = n
    bytes_accessed = int(sum(a.size * a.dtype.itemsize for a in args)
                         + Bp * cout_p * 4)
    vmem_limit = int(min(64 << 20, max(2 * bytes_accessed + (4 << 20), 32 << 20)))

    vmem_spec = pl.BlockSpec(memory_space=pltpu.MemorySpace.VMEM)
    out_p = pl.pallas_call(
        _make_fused_mlp_kernel(n_dims),
        out_shape=jax.ShapeDtypeStruct((Bp, cout_p), jnp.float32),
        in_specs=[vmem_spec] * len(args),
        out_specs=vmem_spec,
        compiler_params=pltpu.CompilerParams(vmem_limit_bytes=vmem_limit),
        cost_estimate=pl.CostEstimate(
            flops=int(flops), bytes_accessed=bytes_accessed, transcendentals=0),
    )(*args)

    return out_p[:B, :num_classes]


# ---------------------------------------------------------------------------
# Parameter init (deterministic, mirrors module __init__ shapes)
# ---------------------------------------------------------------------------
def init_params(key, in_dim, num_classes, num_hidden_layers, hidden_dim):
    params = {"hidden": []}
    d_in = in_dim
    for _ in range(num_hidden_layers):
        key, k_w, k_b, k_m, k_v = jax.random.split(key, 5)
        layer = {
            # PyTorch nn.Linear weight is [out, in]; stored transposed [in, out]
            "w_t": jax.random.normal(k_w, (d_in, hidden_dim), jnp.float32) * 0.05,
            "b": jax.random.normal(k_b, (1, hidden_dim), jnp.float32) * 0.01,
            # BatchNorm1d params / running stats (non-trivial, deterministic)
            "gamma": jnp.ones((1, hidden_dim), jnp.float32),
            "beta": jnp.zeros((1, hidden_dim), jnp.float32),
            "mean": jax.random.normal(k_m, (1, hidden_dim), jnp.float32) * 0.1,
            "var": jnp.abs(jax.random.normal(k_v, (1, hidden_dim), jnp.float32)) + 0.5,
        }
        params["hidden"].append(layer)
        d_in = hidden_dim
    key, k_w, k_b = jax.random.split(key, 3)
    params["clf"] = {
        "w_t": jax.random.normal(k_w, (d_in, num_classes), jnp.float32) * 0.05,
        "b": jax.random.normal(k_b, (1, num_classes), jnp.float32) * 0.01,
    }
    return params


def fc_classifier_reference(params, emb):
    """Plain JAX f32 reference (unfused, unfolded BN) for correctness check."""
    for layer in params["hidden"]:
        z = emb @ layer["w_t"] + layer["b"]
        h = (z - layer["mean"]) * jax.lax.rsqrt(layer["var"] + BN_EPS) \
            * layer["gamma"] + layer["beta"]
        emb = jnp.maximum(h, 0.0)
    return emb @ params["clf"]["w_t"] + params["clf"]["b"]


# ---------------------------------------------------------------------------
if __name__ == "__main__":
    B = 8
    IN_DIM = 32          # LazyLinear infers this from the input embedding
    HIDDEN_DIM = 32
    NUM_CLASSES = 8
    NUM_HIDDEN_LAYERS = 2

    key = jax.random.PRNGKey(0)
    key, k_x = jax.random.split(key)
    emb = jax.random.normal(k_x, (B, IN_DIM), jnp.float32)

    params = init_params(key, IN_DIM, NUM_CLASSES, NUM_HIDDEN_LAYERS, HIDDEN_DIM)

    # One-time parameter preparation (fold BN, pad, cast bf16, pack biases).
    prepared = prepare_fc_classifier(params, IN_DIM)

    out = fc_classifier_forward(prepared, emb)
    out = jax.block_until_ready(out)

    ref = fc_classifier_reference(params, emb)
    assert out.shape == (B, NUM_CLASSES)
    # bf16 weights/activations with f32 accumulation -> loosened tolerance.
    assert jnp.allclose(out, ref, atol=3e-2, rtol=3e-2)

    print("KERNEL_OK")
</pallas_src>

<mosaic_0001>
module attributes {stable_mosaic.version = 11 : i64} {
  func.func @kernel(%arg0: memref<8x32xbf16, #tpu.memory_space<vmem>>, %arg1: memref<32x32xbf16, #tpu.memory_space<vmem>>, %arg2: memref<32x32xbf16, #tpu.memory_space<vmem>>, %arg3: memref<32x128xbf16, #tpu.memory_space<vmem>>, %arg4: memref<3x128xf32, #tpu.memory_space<vmem>>, %arg5: memref<8x128xf32, #tpu.memory_space<vmem>>) attributes {dimension_semantics = [], scalar_prefetch = 0 : i64, scratch_operands = 0 : i64, tpu.core_type = #tpu.core_type<tc>} {
    %c0 = arith.constant 0 : index
    %c0_0 = arith.constant 0 : index
    %0 = vector.load %arg4[%c0, %c0_0] : memref<3x128xf32, #tpu.memory_space<vmem>>, vector<3x128xf32>
    %c0_1 = arith.constant 0 : index
    %c0_2 = arith.constant 0 : index
    %1 = vector.load %arg0[%c0_1, %c0_2] : memref<8x32xbf16, #tpu.memory_space<vmem>>, vector<8x32xbf16>
    %c0_3 = arith.constant 0 : index
    %c0_4 = arith.constant 0 : index
    %2 = vector.load %arg1[%c0_3, %c0_4] : memref<32x32xbf16, #tpu.memory_space<vmem>>, vector<32x32xbf16>
    %cst = arith.constant dense<0.000000e+00> : vector<8x32xf32>
    %3 = tpu.matmul %1, %2, %cst {dimension_numbers = #tpu.dot_dimension_numbers<[1], [0], [0], [1], [0, 0, 1, 1], [], []>} : vector<8x32xbf16>, vector<32x32xbf16>, vector<8x32xf32> -> vector<8x32xf32>
    %4 = vector.extract_strided_slice %0 {offsets = [0, 0], sizes = [1, 32], strides = [1, 1]} : vector<3x128xf32> to vector<1x32xf32>
    %5 = vector.broadcast %4 : vector<1x32xf32> to vector<8x32xf32>
    %6 = arith.addf %3, %5 : vector<8x32xf32>
    %cst_5 = arith.constant 0.000000e+00 : f32
    %7 = vector.broadcast %cst_5 : f32 to vector<8x32xf32>
    %8 = arith.maximumf %6, %7 : vector<8x32xf32>
    %9 = arith.truncf %8 : vector<8x32xf32> to vector<8x32xbf16>
    %c0_6 = arith.constant 0 : index
    %c0_7 = arith.constant 0 : index
    %10 = vector.load %arg2[%c0_6, %c0_7] : memref<32x32xbf16, #tpu.memory_space<vmem>>, vector<32x32xbf16>
    %cst_8 = arith.constant dense<0.000000e+00> : vector<8x32xf32>
    %11 = tpu.matmul %9, %10, %cst_8 {dimension_numbers = #tpu.dot_dimension_numbers<[1], [0], [0], [1], [0, 0, 1, 1], [], []>} : vector<8x32xbf16>, vector<32x32xbf16>, vector<8x32xf32> -> vector<8x32xf32>
    %12 = vector.extract_strided_slice %0 {offsets = [1, 0], sizes = [1, 32], strides = [1, 1]} : vector<3x128xf32> to vector<1x32xf32>
    %13 = vector.broadcast %12 : vector<1x32xf32> to vector<8x32xf32>
    %14 = arith.addf %11, %13 : vector<8x32xf32>
    %cst_9 = arith.constant 0.000000e+00 : f32
    %15 = vector.broadcast %cst_9 : f32 to vector<8x32xf32>
    %16 = arith.maximumf %14, %15 : vector<8x32xf32>
    %17 = arith.truncf %16 : vector<8x32xf32> to vector<8x32xbf16>
    %c0_10 = arith.constant 0 : index
    %c0_11 = arith.constant 0 : index
    %18 = vector.load %arg3[%c0_10, %c0_11] : memref<32x128xbf16, #tpu.memory_space<vmem>>, vector<32x128xbf16>
    %cst_12 = arith.constant dense<0.000000e+00> : vector<8x128xf32>
    %19 = tpu.matmul %17, %18, %cst_12 {dimension_numbers = #tpu.dot_dimension_numbers<[1], [0], [0], [1], [0, 0, 1, 1], [], []>} : vector<8x32xbf16>, vector<32x128xbf16>, vector<8x128xf32> -> vector<8x128xf32>
    %20 = vector.extract_strided_slice %0 {offsets = [2, 0], sizes = [1, 128], strides = [1, 1]} : vector<3x128xf32> to vector<1x128xf32>
    %21 = vector.broadcast %20 : vector<1x128xf32> to vector<8x128xf32>
    %22 = arith.addf %19, %21 : vector<8x128xf32>
    %c0_13 = arith.constant 0 : index
    %c0_14 = arith.constant 0 : index
    %23 = vector.load %arg5[%c0_13, %c0_14] : memref<8x128xf32, #tpu.memory_space<vmem>>, vector<8x128xf32>
    tpu.vector_store %arg5[%c0_13, %c0_14], %22 {strides = array<i32>} : memref<8x128xf32, #tpu.memory_space<vmem>>, vector<8x128xf32>,
    return
  }
}

</mosaic_0001>

<bundles_post_ra>
// kernel: tpu_custom_call.1
= control target key start
LH: loop header
LB: loop body
LE: loop exit
PB: predicated region body
PF: predicated region fallthrough
CT: control target
= control target key end

     0   :  { %10 = vsyncpa [#allocation3], 0  ;;  %s523_s0 = inlined_call_operand.hbm [shape: bf16[8,32], index: 0, kind: input, shape index: {}]   ;;  %s524_s1 = inlined_call_operand.hbm [shape: bf16[32,32], index: 1, kind: input, shape index: {}]   ;;  %s525_s2 = inlined_call_operand.hbm [shape: bf16[32,32], index: 2, kind: input, shape index: {}]   ;;  %s526_s3 = inlined_call_operand.hbm [shape: bf16[32,128], index: 3, kind: input, shape index: {}]   ;;  %s527_s4 = inlined_call_operand.vmem [shape: f32[3,128], index: 4, kind: input, shape index: {}]   ;;  %s528_s5 = inlined_call_operand.hbm [shape: f32[8,128], index: 5, kind: output, shape index: {}]  }
   0x1   :  { %11 = vsyncpa [#allocation6], 0 }
   0x2   :  { %12 = vsyncpa [#allocation9], 0 }
   0x3   :  { %13 = vsyncpa [#allocation4], 0  ;;  %s454_s18 = smov [#allocation5]  }
   0x4   :  { %s29_s19 = sshll.u32 %s454_s18, 4  ;;  %s30_s19 = int_to_ptr.vmem [resolvable:$true] %s29_s19 }
   0x5   :  { %s354_s20 = scalar_lea.vmem %s30_s19, 256  ;;  %p359_p1 = scmp.lt.s32.totalorder %s30_s19, %s30_s19 }
   0x6   :  { %p355_p0 = scmp.ne.s32.totalorder %s30_s19, %s354_s20  ;;  %p360_p2 = scmp.lt.s32.totalorder %s354_s20, %s354_s20 }
   0x8   :  { %p361_p3 = por %p360_p2, %p359_p1 }
   0xa   :  { %p362_p4 = pnand %p361_p3, %p355_p0 }
   0xc   :  { %365 = shalt.err (!%p362_p4)
}
   0xd   :  { %s455_s21 = smov 64   ;;  %s456_s22 = smov 4  }
   0xe   :  { %35 = dma.hbm_to_vmem [thread:$0]  %s524_s1, 256, %s30_s19, [#allocation6], %s455_s21, %s455_s21, %s456_s22  }
   0xf   :  { %s457_s25 = smov [#allocation2]   ;;  %s458_s27 = smov [#allocation7]  }
  0x10   :  { %s20_s26 = sshll.u32 %s457_s25, 4  ;;  %s41_s28 = sshll.u32 %s458_s27, 4  ;;  %s21_s26 = int_to_ptr.vmem [resolvable:$true] %s20_s26  ;;  %s42_s28 = int_to_ptr.vmem [resolvable:$true] %s41_s28 }
  0x11   :  { %s374_s29 = scalar_lea.vmem %s21_s26, 64  ;;  %p379_p6 = scmp.lt.s32.totalorder %s21_s26, %s21_s26 }
  0x12   :  { %p375_p5 = scmp.ne.s32.totalorder %s21_s26, %s374_s29  ;;  %p380_p7 = scmp.lt.s32.totalorder %s374_s29, %s374_s29 }
  0x14   :  { %p381_p8 = por %p380_p7, %p379_p6 }
  0x16   :  { %p382_p9 = pnand %p381_p8, %p375_p5 }
  0x18   :  { %385 = shalt.err (!%p382_p9)
}
  0x19   :  { %23 = dma.hbm_to_vmem [thread:$0]  %s523_s0, 64, %s21_s26, [#allocation3]  }
  0x1a   :  { %s394_s7 = scalar_lea.vmem %s42_s28, 256  ;;  %p399_p11 = scmp.lt.s32.totalorder %s42_s28, %s42_s28 }
  0x1b   :  { %p395_p10 = scmp.ne.s32.totalorder %s42_s28, %s394_s7  ;;  %p400_p12 = scmp.lt.s32.totalorder %s394_s7, %s394_s7 }
  0x1d   :  { %p401_p13 = por %p400_p12, %p399_p11 }
  0x1f   :  { %p402_p0 = pnand %p401_p13, %p395_p10 }
  0x21   :  { %405 = shalt.err (!%p402_p0)
}
  0x22   :  { %47 = dma.hbm_to_vmem [thread:$0]  %s525_s2, 256, %s42_s28, [#allocation6], %s455_s21, %s455_s21, %s456_s22  }
  0x23   :  { %s459_s9 = smov [#allocation8]  }
  0x24   :  { %s53_s10 = sshll.u32 %s459_s9, 4  ;;  %s54_s10 = int_to_ptr.vmem [resolvable:$true] %s53_s10 }
  0x25   :  { %s414_s11 = scalar_lea.vmem %s54_s10, 256  ;;  %p419_p2 = scmp.lt.s32.totalorder %s54_s10, %s54_s10 }
  0x26   :  { %p415_p1 = scmp.ne.s32.totalorder %s54_s10, %s414_s11  ;;  %p420_p3 = scmp.lt.s32.totalorder %s414_s11, %s414_s11 }
  0x28   :  { %p421_p4 = por %p420_p3, %p419_p2 }
  0x2a   :  { %p422_p5 = pnand %p421_p4, %p415_p1 }
  0x2c   :  { %425 = shalt.err (!%p422_p5)
}
  0x2d   :  { %59 = dma.hbm_to_vmem [thread:$0]  %s526_s3, 256, %s54_s10, [#allocation9], %s455_s21, %s455_s21, %s456_s22  }
  0x2e   :  { %446 = dma.done.wait [#allocation3], 64  }
  0x2f   :  { %447 = vsyncadd [#allocation3], 4294967232 }
  0x30   :  { %448 = dma.done.wait [#allocation6], 512  }
  0x31   :  { %449 = vsyncadd [#allocation6], 4294966784 }
  0x32   :  { %450 = dma.done.wait [#allocation9], 256  }
  0x33   :  { %451 = vsyncadd [#allocation9], 4294967040  ;;  %v460_v0 = vmov 0.0   ;;  %vm461_vm0 = vmmov 0   ;;  %v340_v1 = vld [vmem:[#allocation5 + $0x8] sm:$0xff]   ;;  %v341_v2 = vld [vmem:[#allocation5] sm:$0xff]   ;;  %v81_v7 = vlaneseq }
  0x34   :  { %307 = vmatprep.subr.bf16.mxu0 %v460_v0  ;;  %311 = vmatprep.mubr.msk.bf16.mxu0 %vm461_vm0, %v460_v0  ;;  %v76_v3 = vld [vmem:[#allocation2] sm:$0xf]  ;;  %vm97_vm1 = vcmask 261120   ;;  %v343_v5 = vld [vmem:[#allocation7] sm:$0xff]   ;;  %v344_v6 = vld [vmem:[#allocation8 + $0x8] sm:$0xff]  }
  0x35   :  { %315 = vmatprep.subr.bf16.mxu1 %v460_v0  ;;  %319 = vmatprep.mubr.msk.bf16.mxu1 %vm461_vm0, %v460_v0  ;;  %v342_v4 = vld [vmem:[#allocation7 + $0x8] sm:$0xff]   ;;  %v82_v8 = vshrl.u32 %v81_v7, 7  ;;  %v345_v19 = vld [vmem:[#allocation8] sm:$0xff]  }
  0x36   :  { %308 = vmatpush3.bf16.msra.mxu0 %v340_v1  ;;  %316 = vmatpush3.bf16.msra.mxu1 %v342_v4  ;;  %v75_v10 = vld [vmem:[%s527_s4] sm:$0x7]  ;;  %s462_s4 = smov [#allocation10]  }
  0x37   :  { %309 = vmatprep.subr.bf16.mxu0 %v460_v0  ;;  %317 = vmatprep.subr.bf16.mxu1 %v460_v0  ;;  %v83_v9 = vsub.s32 0, %v82_v8  ;;  %v149_v20 = vsub.s32 1, %v82_v8  ;;  %v214_v29 = vsub.s32 2, %v82_v8  ;;  %s278_s13 = sshll.u32 %s462_s4, 4  ;;  %s279_s13 = int_to_ptr.vmem [resolvable:$true] %s278_s13 }
  0x38   :  { %s426_s14 = scalar_lea.vmem %s279_s13, 128  ;;  %p431_p7 = scmp.lt.s32.totalorder %s279_s13, %s279_s13 }
  0x39   :  { %v84_v11 = vrot.slane %v75_v10, %v83_v9  ;;  %v150_v21 = vrot.slane %v75_v10, %v149_v20  ;;  %v215_v30 = vrot.slane %v75_v10, %v214_v29  ;;  %p427_p6 = scmp.ne.s32.totalorder %s279_s13, %s426_s14  ;;  %p432_p8 = scmp.lt.s32.totalorder %s426_s14, %s426_s14 }
  0x3a   :  { %310 = vmatpush3.bf16.msra.mxu0 %v341_v2  ;;  %318 = vmatpush3.bf16.msra.mxu1 %v343_v5 }
  0x3b   :  { %323 = vmatprep.subr.bf16.mxu0 %v460_v0  ;;  %p433_p9 = por %p432_p8, %p431_p7 }
  0x3d   :  { %312 = vmatmul.mubr.msk.bf16.vlgmr.msra.gmra.mxu0 %vm97_vm1, %v76_v3  ;;  %p434_p10 = pnand %p433_p9, %p427_p6 }
  0x3e   :  { %327 = vmatprep.mubr.msk.bf16.mxu0 %vm461_vm0, %v460_v0  ;;  %324 = vmatpush3.bf16.msra.mxu0 %v344_v6 }
  0x3f   :  { %325 = vmatprep.subr.bf16.mxu0 %v460_v0 }
  0x42   :  { %326 = vmatpush3.bf16.msra.mxu0 %v345_v19 }
  0xfd   :  { %v135_v12 = vpop.f32.mrf.mxu0 }
  0xfe   :  { %v136_v13 = vadd.f32 %v135_v12, %v84_v11 }
  0xff   :  { %v313_v14 = vpop.f32.mrf.mxu0 }
 0x100   :  { %v141_v15 = vmax.f32 %v136_v13, 0.0 }
 0x101   :  { %v138_v16 = vpop.f32.mrf.mxu0 }
 0x102   :  { %v142_v17 = vpack.c.bf16 %v141_v15, %v141_v15 }
 0x103   :  { %v314_v18 = vpop.f32.mrf.mxu0 }
 0x104   :  { %320 = vmatmul.mubr.msk.bf16.vlgmr.msra.gmra.mxu1 %vm97_vm1, %v142_v17 }
 0x1c4   :  { %v200_v22 = vpop.f32.mrf.mxu1 }
 0x1c5   :  { %v201_v23 = vadd.f32 %v200_v22, %v150_v21 }
 0x1c6   :  { %v321_v24 = vpop.f32.mrf.mxu1 }
 0x1c7   :  { %v206_v25 = vmax.f32 %v201_v23, 0.0 }
 0x1c8   :  { %v203_v26 = vpop.f32.mrf.mxu1 }
 0x1c9   :  { %v207_v27 = vpack.c.bf16 %v206_v25, %v206_v25 }
 0x1ca   :  { %v322_v28 = vpop.f32.mrf.mxu1 }
 0x1cb   :  { %328 = vmatmul.mubr.msk.bf16.vlgmr.msra.gmra.mxu0 %vm97_vm1, %v207_v27 }
 0x28b   :  { %v265_v31 = vpop.f32.mrf.mxu0 }
 0x28c   :  { %v266_v32 = vadd.f32 %v265_v31, %v215_v30 }
 0x28d   :  { %v329_v33 = vpop.f32.mrf.mxu0 }
 0x28e   :  { %271 = vst [vmem:[#allocation10] sm:$0xff] %v266_v32 }
 0x28f   :  { %v268_v34 = vpop.f32.mrf.mxu0 }
 0x290   :  { %437 = shalt.err (!%p434_p10)
}
 0x291   :  { %281 = dma.vmem_to_hbm [thread:$0]  %s279_s13, 128, %s528_s5, [#allocation4]   ;;  %v330_v35 = vpop.f32.mrf.mxu0 }
 0x292   :  { %452 = dma.done.wait [#allocation4], 128  }
 0x293   :  { %453 = vsyncadd [#allocation4], 4294967168 }
 0x294   :  { %285 = vsyncpa [#allocation3], 1 }
 0x295   :  { %286 = vsyncpa [#allocation6], 1 }
 0x296   :  { %287 = vsyncpa [#allocation9], 1 }
 0x297   :  { %288 = vsyncpa [#allocation4], 1 }

</bundles_post_ra>
